<compile_context>
chip_gen: v5e
topology: v5e:2x2
jax: 0.10.0
libtpu: 0.0.40
codegen_flags: <defaults>
</compile_context>

<pallas_src>
import functools

import jax
import jax.numpy as jnp
from jax import lax
from jax.experimental import pallas as pl
from jax.experimental.pallas import tpu as pltpu


# ----------------------------------------------------------------------------
# Hardware-aware configuration
# ----------------------------------------------------------------------------
def _vmem_limit_bytes():
    cap = None
    try:
        info_fn = getattr(pltpu, "get_tpu_info", None)
        if info_fn is not None:
            cap = int(info_fn().vmem_capacity_bytes)
    except Exception:
        cap = None
    if cap is None:
        cap = 128 * 1024 * 1024          # assume v5e/v6e class if unknown
    # ~3/4 of physical: ~96 MiB on v5e/v6e (128 MiB), ~48 MiB on v7x (64 MiB).
    return min((cap * 3) // 4, 96 * 1024 * 1024)


_VMEM_LIMIT = _vmem_limit_bytes()

# Budget-aware tile caps (sublane cap, lane cap).
if _VMEM_LIMIT >= (80 << 20):
    _SUB_CAP, _LANE_CAP = 1024, 4096
elif _VMEM_LIMIT >= (40 << 20):
    _SUB_CAP, _LANE_CAP = 512, 2048
else:
    _SUB_CAP, _LANE_CAP = 256, 1024

# bf16 MXU operands only when the XLA backend can execute bf16xbf16->f32
# (real TPU); otherwise keep f32 so interpret/CPU runs cleanly.
_MXU_DTYPE = jnp.bfloat16 if jax.default_backend() == "tpu" else jnp.float32


def _pick_tile(n, align, cap):
    """Largest divisor of n that is a multiple of `align` and <= cap.
    Falls back to n (full-array block, always legal) if none exists."""
    best = None
    t = align
    top = min(n, cap)
    while t <= top:
        if n % t == 0:
            best = t
        t += align
    return best if best is not None else n


# ----------------------------------------------------------------------------
# Pallas kernels
# ----------------------------------------------------------------------------
def _mm_kernel(a_ref, b_ref, o_ref):
    # One (tm, K) x (K, tn) MXU tile; accumulate in f32, store in o dtype.
    o_ref[...] = jnp.dot(a_ref[...], b_ref[...],
                         preferred_element_type=jnp.float32).astype(o_ref.dtype)


def _mm_sumsq_kernel(w_ref, p_ref, o_ref, ss_ref):
    """GEMM tile (O, tn) += W(O, tk) @ P(tk, tn), K tiled as the inner
    reduction axis; on the last K step the tile's sum of squares is added to a
    (1,1) resident accumulator (two-pass global L2 normalization)."""
    j = pl.program_id(0)          # NP tile
    k = pl.program_id(1)          # K tile (reduction, inner/last)

    @pl.when(k == 0)
    def _():
        o_ref[...] = jnp.zeros_like(o_ref)

    @pl.when(jnp.logical_and(j == 0, k == 0))
    def _():
        ss_ref[...] = jnp.zeros_like(ss_ref)

    o_ref[...] += jnp.dot(w_ref[...], p_ref[...],
                          preferred_element_type=jnp.float32)

    @pl.when(k == pl.num_programs(1) - 1)
    def _():
        acc = o_ref[...]
        ss_ref[...] = ss_ref[...] + jnp.sum(acc * acc)


def _sumsq_kernel(x_ref, ss_ref):
    """Partial sum of squares of a (tr, tc) tile into a (1,1) accumulator."""
    @pl.when(jnp.logical_and(pl.program_id(0) == 0, pl.program_id(1) == 0))
    def _():
        ss_ref[...] = jnp.zeros_like(ss_ref)
    x = x_ref[...].astype(jnp.float32)
    ss_ref[...] = ss_ref[...] + jnp.sum(x * x)


def _scale_kernel(ss_ref, x_ref, o_ref, *, eps):
    """o = x / max(sqrt(ss), eps) per tile (second pass of the L2 normalize)."""
    inv = 1.0 / jnp.maximum(jnp.sqrt(ss_ref[...]), jnp.float32(eps))
    o_ref[...] = x_ref[...].astype(jnp.float32) * inv


def _sigma_scale_kernel(w_ref, u_ref, p_ref, o_ref, s_acc, *, norm_bound):
    """Reformulated fused forward:  S = U(O,NP) @ P(K,NP)^T accumulated over NP
    tiles into a small (O, K) f32 scratch; epilogue computes
    sigma = sum(W * S), factor = max(1, sigma/bound), out = W / factor."""
    j = pl.program_id(0)

    @pl.when(j == 0)
    def _():
        s_acc[...] = jnp.zeros_like(s_acc)

    s_acc[...] += lax.dot_general(
        u_ref[...], p_ref[...],
        dimension_numbers=(((1,), (1,)), ((), ())),
        preferred_element_type=jnp.float32)

    @pl.when(j == pl.num_programs(0) - 1)
    def _():
        w = w_ref[...]
        sigma = jnp.sum(w * s_acc[...])
        factor = jnp.maximum(jnp.float32(1.0), sigma / jnp.float32(norm_bound))
        o_ref[...] = w * (1.0 / factor)


# ----------------------------------------------------------------------------
# Pallas wrappers
# ----------------------------------------------------------------------------
def pallas_matmul(a, b, out_dtype=jnp.float32):
    """(M, N) = a(M, K) @ b(K, N); 2-D parallel grid over (M, N) tiles."""
    M, K = a.shape
    K2, N = b.shape
    assert K == K2
    tm = _pick_tile(M, 8, _SUB_CAP)
    tn = _pick_tile(N, 128, _LANE_CAP)
    return pl.pallas_call(
        _mm_kernel,
        out_shape=jax.ShapeDtypeStruct((M, N), out_dtype),
        grid=(M // tm, N // tn),
        in_specs=[pl.BlockSpec((tm, K), lambda i, j: (i, 0)),
                  pl.BlockSpec((K, tn), lambda i, j: (0, j))],
        out_specs=pl.BlockSpec((tm, tn), lambda i, j: (i, j)),
        compiler_params=pltpu.CompilerParams(
            dimension_semantics=("parallel", "parallel"),
            vmem_limit_bytes=_VMEM_LIMIT),
    )(a.astype(_MXU_DTYPE), b.astype(_MXU_DTYPE))


def pallas_sumsq(x2d):
    """Global sum of squares of a 2-D array, tiled (reduction grid)."""
    R, C = x2d.shape
    tr = _pick_tile(R, 8, _SUB_CAP)
    tc = _pick_tile(C, 128, _LANE_CAP)
    return pl.pallas_call(
        _sumsq_kernel,
        out_shape=jax.ShapeDtypeStruct((1, 1), jnp.float32),
        grid=(R // tr, C // tc),
        in_specs=[pl.BlockSpec((tr, tc), lambda i, j: (i, j))],
        out_specs=pl.BlockSpec((1, 1), lambda i, j: (0, 0)),
        compiler_params=pltpu.CompilerParams(
            dimension_semantics=("arbitrary", "arbitrary"),
            vmem_limit_bytes=_VMEM_LIMIT),
    )(x2d)


def pallas_scale_by_invnorm(x2d, ss, eps):
    """x / max(sqrt(ss), eps), tiled over both dims (parallel grid)."""
    R, C = x2d.shape
    tr = _pick_tile(R, 8, _SUB_CAP)
    tc = _pick_tile(C, 128, _LANE_CAP)
    return pl.pallas_call(
        functools.partial(_scale_kernel, eps=float(eps)),
        out_shape=jax.ShapeDtypeStruct((R, C), jnp.float32),
        grid=(R // tr, C // tc),
        in_specs=[pl.BlockSpec((1, 1), lambda i, j: (0, 0)),
                  pl.BlockSpec((tr, tc), lambda i, j: (i, j))],
        out_specs=pl.BlockSpec((tr, tc), lambda i, j: (i, j)),
        compiler_params=pltpu.CompilerParams(
            dimension_semantics=("parallel", "parallel"),
            vmem_limit_bytes=_VMEM_LIMIT),
    )(ss, x2d)


def pallas_l2_normalize(x, eps):
    """Global L2 normalization of any array (two tiled passes)."""
    n = x.size
    shp = (n // 128, 128) if n % 128 == 0 else (1, n)
    x2 = x.reshape(shp).astype(jnp.float32)
    ss = pallas_sumsq(x2)
    out = pallas_scale_by_invnorm(x2, ss, eps)
    return out.reshape(x.shape)


def pallas_conv_l2norm(w_mat, patches_t, eps):
    """global_l2_normalize( w_mat(O, K) @ patches_t(K, NP) ), NP & K tiled.

    The norm is computed correctly under NP tiling: per-tile sum of squares is
    accumulated into a (1,1) resident output, then a second tiled pass scales.
    (Both grid axes are 'arbitrary' because of the shared accumulator.)"""
    O, K = w_mat.shape
    K2, NP = patches_t.shape
    assert K == K2
    tn = _pick_tile(NP, 128, _LANE_CAP)
    tk = _pick_tile(K, 128, _LANE_CAP)     # 128-aligned (was 256): keeps K pipeline
    u_flat, ss = pl.pallas_call(
        _mm_sumsq_kernel,
        out_shape=(jax.ShapeDtypeStruct((O, NP), jnp.float32),
                   jax.ShapeDtypeStruct((1, 1), jnp.float32)),
        grid=(NP // tn, K // tk),
        in_specs=[pl.BlockSpec((O, tk), lambda j, k: (0, k)),
                  pl.BlockSpec((tk, tn), lambda j, k: (k, j))],
        out_specs=(pl.BlockSpec((O, tn), lambda j, k: (0, j)),
                   pl.BlockSpec((1, 1), lambda j, k: (0, 0))),
        compiler_params=pltpu.CompilerParams(
            dimension_semantics=("arbitrary", "arbitrary"),
            vmem_limit_bytes=_VMEM_LIMIT),
    )(w_mat.astype(_MXU_DTYPE), patches_t.astype(_MXU_DTYPE))
    return pallas_scale_by_invnorm(u_flat, ss, eps)


def pallas_conv_sigma_scale(w_mat, patches_t, u_mat, norm_bound):
    """Fused forward scaling with the sigma reformulation (NP = reduction)."""
    O, K = w_mat.shape
    K2, NP = patches_t.shape
    assert K == K2 and u_mat.shape == (O, NP)
    tn = _pick_tile(NP, 128, _LANE_CAP)
    return pl.pallas_call(
        functools.partial(_sigma_scale_kernel, norm_bound=float(norm_bound)),
        out_shape=jax.ShapeDtypeStruct((O, K), jnp.float32),
        grid=(NP // tn,),
        in_specs=[pl.BlockSpec((O, K), lambda j: (0, 0)),
                  pl.BlockSpec((O, tn), lambda j: (0, j)),
                  pl.BlockSpec((K, tn), lambda j: (0, j))],
        out_specs=pl.BlockSpec((O, K), lambda j: (0, 0)),
        scratch_shapes=[pltpu.VMEM((O, K), jnp.float32)],
        compiler_params=pltpu.CompilerParams(
            dimension_semantics=("arbitrary",),
            vmem_limit_bytes=_VMEM_LIMIT),
    )(w_mat.astype(jnp.float32), u_mat.astype(_MXU_DTYPE),
      patches_t.astype(_MXU_DTYPE))


# ----------------------------------------------------------------------------
# im2col / col2im glue (pure XLA relayouts under jit)
# ----------------------------------------------------------------------------
def _im2col_T(x, kh, kw, stride, padding):
    """(N,C,H,W) -> patches^T of shape (C*kh*kw, N*Ho*Wo)."""
    n, c, h, w = x.shape
    sh, sw = stride
    ho = (h + 2 * padding - kh) // sh + 1
    wo = (w + 2 * padding - kw) // sw + 1
    xp = jnp.pad(x, ((0, 0), (0, 0), (padding, padding), (padding, padding)))
    cols = []
    for i in range(kh):
        for j in range(kw):
            cols.append(xp[:, :, i:i + sh * ho:sh, j:j + sw * wo:sw])
    pt = jnp.stack(cols, axis=0).transpose(2, 0, 1, 3, 4)
    return pt.reshape(c * kh * kw, n * ho * wo), (n, ho, wo)


def _col2im(cols, x_shape, kh, kw, stride, padding, ho, wo):
    """Adjoint of _im2col_T: scatter-add back to (N,C,H,W), f32 accumulation."""
    n, c, h, w = x_shape
    sh, sw = stride
    cols_r = cols.reshape(c, kh, kw, n, ho, wo)
    vp = jnp.zeros((n, c, h + 2 * padding, w + 2 * padding), jnp.float32)
    for i in range(kh):
        for j in range(kw):
            blk = cols_r[:, i, j].transpose(1, 0, 2, 3).astype(jnp.float32)
            vp = vp.at[:, :, i:i + sh * ho:sh, j:j + sw * wo:sw].add(blk)
    if padding > 0:
        vp = vp[:, :, padding:padding + h, padding:padding + w]
    return vp


# ----------------------------------------------------------------------------
# Functional pieces of the module
# ----------------------------------------------------------------------------
def _power_step(weight, u, v, stride, padding, input_shape):
    """One power iteration (u, v) -> (u_hat, v_hat)."""
    O, C, kh, kw = weight.shape
    w_mat = weight.reshape(O, C * kh * kw)

    # v_ = conv_transpose2d(u, W)  ==  col2im(W_mat^T @ u_mat)
    n, _, ho, wo = u.shape
    u_mat = u.transpose(1, 0, 2, 3).reshape(O, n * ho * wo)
    cols = pallas_matmul(w_mat.T, u_mat, out_dtype=_MXU_DTYPE)   # (C*kh*kw, NP)
    v_ = _col2im(cols, input_shape, kh, kw, stride, padding, ho, wo)
    v_hat = pallas_l2_normalize(v_, 1e-12)      # F.normalize default eps

    # u_hat = normalize(conv2d(v_hat, W)) -- tiled GEMM + two-pass L2 norm.
    pt, (n2, ho2, wo2) = _im2col_T(v_hat, kh, kw, stride, padding)
    u_mat_hat = pallas_conv_l2norm(w_mat, pt, 1e-12)             # (O, NP)
    u_hat = u_mat_hat.reshape(O, n2, ho2, wo2).transpose(1, 0, 2, 3)
    return u_hat, v_hat


def _spectral_scale(weight, u, v, stride, padding, norm_bound):
    """weight / max(1, <conv2d(v, W), u> / norm_bound)  (single fused kernel)."""
    O, C, kh, kw = weight.shape
    w_mat = weight.reshape(O, C * kh * kw)
    pt, (n, ho, wo) = _im2col_T(v, kh, kw, stride, padding)
    u_mat = u.transpose(1, 0, 2, 3).reshape(O, n * ho * wo)
    w_norm_mat = pallas_conv_sigma_scale(w_mat, pt, u_mat, norm_bound)
    return w_norm_mat.reshape(O, C, kh, kw)


class SpectralNormConv2dPallas:
    """Forward-pass semantics of dal_toolbox's SpectralNormConv2d."""

    def __init__(self, weight, input_shape, output_shape, stride, padding,
                 norm_bound=1.0, n_power_iterations=1, eps=1e-12, key=None):
        weight = jnp.asarray(weight, jnp.float32)
        if weight.ndim <= 1:
            raise ValueError("Expected weight with ndim > 1")
        if n_power_iterations <= 0:
            raise ValueError("Expected n_power_iterations to be positive, got "
                             f"{n_power_iterations}")
        self.norm_bound = float(norm_bound)
        self.input_shape = tuple(int(s) for s in input_shape)
        self.output_shape = tuple(int(s) for s in output_shape)
        self.stride = (int(stride[0]), int(stride[1]))
        self.padding = int(padding)
        self.n_power_iterations = int(n_power_iterations)
        self.eps = float(eps)

        stride_, padding_ = self.stride, self.padding
        in_shape_, bound_ = self.input_shape, self.norm_bound

        def power(w, u, v, *, n_iter):
            def body(_, carry):
                return _power_step(w, carry[0], carry[1],
                                   stride_, padding_, in_shape_)
            return jax.lax.fori_loop(0, n_iter, body, (u, v))

        def fwd_train(w, u, v, *, n_iter):
            u, v = power(w, u, v, n_iter=n_iter)
            return _spectral_scale(w, u, v, stride_, padding_, bound_), u, v

        def fwd_eval(w, u, v):
            return _spectral_scale(w, u, v, stride_, padding_, bound_)

        self._jit_power = jax.jit(power, static_argnames=("n_iter",))
        self._jit_fwd_train = jax.jit(fwd_train, static_argnames=("n_iter",))
        self._jit_fwd_eval = jax.jit(fwd_eval)

        if key is None:
            key = jax.random.PRNGKey(0)
        kv, ku = jax.random.split(key)
        v0 = pallas_l2_normalize(
            jax.random.normal(kv, self.input_shape, jnp.float32), self.eps)
        u0 = pallas_l2_normalize(
            jax.random.normal(ku, self.output_shape, jnp.float32), self.eps)
        u, v = self._jit_power(weight, u0, v0, n_iter=15)
        self._u, self._v = u, v

    def forward(self, weight, training=True):
        weight = jnp.asarray(weight, jnp.float32)
        if training:
            w_norm, u, v = self._jit_fwd_train(
                weight, self._u, self._v, n_iter=self.n_power_iterations)
            self._u, self._v = u, v        # concrete arrays, outside traced code
        else:
            w_norm = self._jit_fwd_eval(weight, self._u, self._v)
        return w_norm


if __name__ == "__main__":
    key = jax.random.PRNGKey(0)
    k_w, k_buf = jax.random.split(key)

    # Small conv layer: weight (Cout=8, Cin=4, 3, 3) acting on (2, 4, 16, 16).
    weight = 0.1 * jax.random.normal(k_w, (8, 4, 3, 3), jnp.float32)
    input_shape = (2, 4, 16, 16)     # v buffer (conv input)
    output_shape = (2, 8, 16, 16)    # u buffer (conv output; stride 1, pad 1)

    mod = SpectralNormConv2dPallas(
        weight, input_shape, output_shape, stride=(1, 1), padding=1,
        norm_bound=1.0, n_power_iterations=1, eps=1e-12, key=k_buf)

    w_norm = mod.forward(weight, training=True)
    w_norm = jax.block_until_ready(w_norm)

    assert w_norm.shape == weight.shape
    assert bool(jnp.all(jnp.isfinite(w_norm)))

    # Pure-JAX reference of the forward scale, using the module's (u, v) buffers.
    conv = jax.lax.conv_general_dilated(
        mod._v, weight, window_strides=(1, 1), padding=[(1, 1), (1, 1)],
        dimension_numbers=("NCHW", "OIHW", "NCHW"))
    sigma_ref = jnp.vdot(conv, mod._u)
    factor_ref = jnp.maximum(jnp.float32(1.0), sigma_ref / 1.0)
    w_norm_ref = weight / factor_ref
    assert bool(jnp.allclose(w_norm, w_norm_ref, rtol=5e-2, atol=1e-4)), \
        "mismatch vs pure-JAX reference"

    print("KERNEL_OK")
</pallas_src>

<mosaic_0001>
module attributes {stable_mosaic.version = 11 : i64} {
  func.func @_sumsq_kernel(%arg0: i32, %arg1: i32, %arg2: memref<16x128xf32, #tpu.memory_space<vmem>>, %arg3: memref<1x1xf32, #tpu.memory_space<vmem>>) attributes {dimension_semantics = [#tpu.dimension_semantics<arbitrary>, #tpu.dimension_semantics<arbitrary>], iteration_bounds = array<i64: 1, 1>, scalar_prefetch = 0 : i64, scratch_operands = 0 : i64, tpu.core_type = #tpu.core_type<tc>, window_params = [{transform_indices = @transform_0, window_bounds = array<i64: 16, 128>}, {pipeline_mode = #tpu.pipeline_mode<synchronous>, transform_indices = @transform_1, window_bounds = array<i64: 1, 1>}]} {
    %c0_i32 = arith.constant 0 : i32
    %0 = arith.cmpi eq, %arg0, %c0_i32 : i32
    %c0_i32_0 = arith.constant 0 : i32
    %1 = arith.cmpi eq, %arg1, %c0_i32_0 : i32
    %2 = arith.andi %0, %1 : i1
    %3 = arith.extui %2 : i1 to i32
    %c0_i32_1 = arith.constant 0 : i32
    %4 = arith.cmpi ne, %3, %c0_i32_1 : i32
    scf.if %4 {
      %cst_7 = arith.constant 0.000000e+00 : f32
      %15 = vector.broadcast %cst_7 : f32 to vector<1x1xf32>
      %c0_8 = arith.constant 0 : index
      %c0_9 = arith.constant 0 : index
      %16 = vector.load %arg3[%c0_8, %c0_9] : memref<1x1xf32, #tpu.memory_space<vmem>>, vector<1x1xf32>
      tpu.vector_store %arg3[%c0_8, %c0_9], %15 {strides = array<i32>} : memref<1x1xf32, #tpu.memory_space<vmem>>, vector<1x1xf32>,
    } else {
    }
    %c0 = arith.constant 0 : index
    %c0_2 = arith.constant 0 : index
    %5 = vector.load %arg2[%c0, %c0_2] : memref<16x128xf32, #tpu.memory_space<vmem>>, vector<16x128xf32>
    %c0_3 = arith.constant 0 : index
    %c0_4 = arith.constant 0 : index
    %6 = vector.load %arg3[%c0_3, %c0_4] : memref<1x1xf32, #tpu.memory_space<vmem>>, vector<1x1xf32>
    %7 = arith.mulf %5, %5 : vector<16x128xf32>
    %8 = vector.shape_cast %7 : vector<16x128xf32> to vector<1x16x128xf32>
    %cst = arith.constant dense<0.000000e+00> : vector<1xf32>
    %9 = vector.multi_reduction <add>, %8, %cst [1, 2] : vector<1x16x128xf32> to vector<1xf32>
    %10 = vector.shape_cast %9 : vector<1xf32> to vector<1x1x1xf32>
    %11 = vector.extract %10[0, 0, 0] : f32 from vector<1x1x1xf32>
    %12 = vector.broadcast %11 : f32 to vector<1x1xf32>
    %13 = arith.addf %6, %12 : vector<1x1xf32>
    %c0_5 = arith.constant 0 : index
    %c0_6 = arith.constant 0 : index
    %14 = vector.load %arg3[%c0_5, %c0_6] : memref<1x1xf32, #tpu.memory_space<vmem>>, vector<1x1xf32>
    tpu.vector_store %arg3[%c0_5, %c0_6], %13 {strides = array<i32>} : memref<1x1xf32, #tpu.memory_space<vmem>>, vector<1x1xf32>,
    return
  }
  func.func @transform_0(%arg0: i32, %arg1: i32) -> (i32, i32) {
    %c0_i32 = arith.constant 0 : i32
    return %arg0, %arg1 : i32, i32
  }
  func.func @transform_1(%arg0: i32, %arg1: i32) -> (i32, i32) {
    %c0_i32 = arith.constant 0 : i32
    %c0_i32_0 = arith.constant 0 : i32
    %c0_i32_1 = arith.constant 0 : i32
    return %c0_i32, %c0_i32_0 : i32, i32
  }
}

</mosaic_0001>

<bundles_post_ra>
// kernel: tpu_custom_call.1
= control target key start
LH: loop header
LB: loop body
LE: loop exit
PB: predicated region body
PF: predicated region fallthrough
CT: control target
= control target key end

     0   :  { %6 = vsyncpa [#allocation3], 0  ;;  %s151_s0 = inlined_call_operand.hbm [shape: f32[16,128], index: 0, kind: input, shape index: {}]   ;;  %s152_s1 = inlined_call_operand.hbm [shape: f32[1,1], index: 1, kind: output, shape index: {}]  }
   0x1   :  { %7 = vsyncpa [#allocation4], 0  ;;  %s12_s8 = sshll.u32 %s151_s0, 4  ;;  %s128_s9 = smov [#allocation2]   ;;  %s13_s8 = int_to_ptr.hbm [resolvable:$true] %s12_s8 }
   0x2   :  { %s14_s10 = sshll.u32 %s128_s9, 4  ;;  %s129_s11 = smov 128   ;;  %s15_s10 = int_to_ptr.vmem [resolvable:$true] %s14_s10 }
   0x3   :  { %s130_s12 = smov 8  }
   0x4   :  { %20 = dma.hbm_to_vmem [thread:$0]  %s13_s8, 256, %s15_s10, [#allocation3], %s129_s11, %s129_s11, %s130_s12  }
   0x5   :  { %124 = dma.done.wait [#allocation3], 256  }
   0x6   :  { %125 = vsyncadd [#allocation3], 4294967040  ;;  %vm31_vm0 = vcmask 0   ;;  %v131_v0 = vmov 0.0   ;;  %v33_v1 = vld [vmem:[#allocation2] sm:$0xff]  ;;  %v34_v2 = vld [vmem:[#allocation2 + $0x8] sm:$0xff] }
   0x7   :  { %32 = vst.msk [vmem:[#allocation5] sm:$0x1] %vm31_vm0, %v131_v0  ;;  %v36_v3 = vmul.f32 %v33_v1, %v33_v1  ;;  %v37_v4 = vmul.f32 %v34_v2, %v34_v2  ;;  %s132_s0 = smov [#allocation5]   ;;  %s59_s16 = sshll.u32 %s152_s1, 4  ;;  %s60_s16 = int_to_ptr.hbm [resolvable:$true] %s59_s16 }
   0x8   :  { %s57_s13 = sshll.u32 %s132_s0, 4  ;;  %s58_s13 = int_to_ptr.vmem [resolvable:$true] %s57_s13 }
   0x9   :  { %v38_v5 = vadd.f32 %v37_v4, %v36_v3 }
   0xb   :  { %39 = vadd.xlane.f32.xlu0 %v38_v5 }
   0xe   :  { %v35_v13 = vld [vmem:[#allocation5] sm:$0x1] }
  0x7e   :  { %v40_v6 = vpop.xlane.xlu0 %39 }
  0x7f   :  { %v41_v7 = vrot.slane %v40_v6, 4 }
  0x81   :  { %v42_v8 = vadd.f32 %v41_v7, %v40_v6 }
  0x83   :  { %v43_v9 = vrot.slane %v42_v8, 2 }
  0x85   :  { %v44_v10 = vadd.f32 %v43_v9, %v42_v8 }
  0x87   :  { %v45_v11 = vrot.slane %v44_v10, 1 }
  0x89   :  { %v46_v12 = vadd.f32 %v45_v11, %v44_v10 }
  0x8b   :  { %69 = vpush %v46_v12 }
  0xbc   :  { %s70_s17 = spop %69 }
  0xbd   :  { %v48_v14 = vstv %s70_s17 }
  0xbe   :  { %v49_v15 = vadd.f32 %v48_v14, %v35_v13 }
  0xc0   :  { %51 = vst.msk [vmem:[#allocation5] sm:$0x1] %vm31_vm0, %v49_v15 }
  0xc1   :  { %62 = dma.vmem_to_hbm [thread:$0]  %s58_s13, 16, %s60_s16, [#allocation4]  }
  0xc2   :  { %126 = dma.done.wait [#allocation4], 16  }
  0xc3   :  { %127 = vsyncadd [#allocation4], 4294967280 }
  0xc4   :  { %67 = vsyncpa [#allocation3], 1 }
  0xc5   :  { %68 = vsyncpa [#allocation4], 1 }

</bundles_post_ra>
